<compile_context>
chip_gen: v5e
topology: v5e:2x2
jax: 0.10.0
libtpu: 0.0.40
codegen_flags: <defaults>
</compile_context>

<pallas_src>
import jax
import jax.numpy as jnp
from jax import lax
from jax.experimental import pallas as pl
from jax.experimental.pallas import tpu as pltpu

EPS = 1e-5


def residual_block_kernel(x_ref, w1_ref, w2_ref, pm_ref, rows_ref, alpha_ref,
                          out_ref):
    H, L = x_ref.shape                    # rows = H, lanes = N*W*C (128-aligned)
    x2 = x_ref[...]

    # Border masks for the ky row shifts: with the batch folded into the lane
    # axis the only row boundaries are the global first / last row.
    hh = lax.broadcasted_iota(jnp.int32, (H, 1), 0)
    mask_top = (hh != 0).astype(jnp.float32)       # zero where h-1 is out of range
    mask_bot = (hh != H - 1).astype(jnp.float32)   # zero where h+1 is out of range

    def conv3x3(inp, w_ref, bias_row):
        # Single MXU matmul; kx taps and the W-direction zero padding are baked
        # into the block-banded weight (L, 3L) built in the wrapper.
        r = jnp.dot(inp, w_ref[...], preferred_element_type=jnp.float32)  # (H, 3L)
        r_top = r[:, 0:L]          # kernel row ky=0 (uses input row h-1)
        r_mid = r[:, L:2 * L]      # ky=1
        r_bot = r[:, 2 * L:3 * L]  # ky=2 (uses input row h+1)
        # H-direction shifts on the XLU; pltpu.roll needs a non-negative shift,
        # H-1 is the circular equivalent of -1.  Masks implement the zero pad.
        top = pltpu.roll(r_top, 1, 0) * mask_top
        bot = pltpu.roll(r_bot, H - 1, 0) * mask_bot
        return r_mid + top + bot + bias_row

    def batchnorm(y, gamma_row, beta_row):
        # One-pass batch statistics (sum, sum of squares); pm averages the
        # per-lane sums over all (n, w) groups of each channel and already
        # contains the 1/(N*H*W) factor.  Single MXU push for both rows.
        s1 = jnp.sum(y, axis=0, keepdims=True)             # (1, L)
        s2 = jnp.sum(y * y, axis=0, keepdims=True)         # (1, L)
        stats = jnp.concatenate([s1, s2], axis=0)          # (2, L)
        avg = jnp.dot(stats, pm_ref[...], preferred_element_type=jnp.float32)
        mean = avg[0:1, :]
        var = avg[1:2, :] - mean * mean                    # biased batch variance
        scale = gamma_row * lax.rsqrt(var + EPS)
        shift = beta_row - mean * scale                    # folded BN affine
        return y * scale + shift

    b1, g1, be1 = rows_ref[0:1, :], rows_ref[1:2, :], rows_ref[2:3, :]
    b2, g2, be2 = rows_ref[3:4, :], rows_ref[4:5, :], rows_ref[5:6, :]

    y = conv3x3(x2, w1_ref, b1)
    y = batchnorm(y, g1, be1)
    alpha = alpha_ref[0]                                    # PReLU slope (SMEM)
    y = jnp.where(y > 0, y, alpha * y)

    z = conv3x3(y, w2_ref, b2)
    z = batchnorm(z, g2, be2)

    out_ref[...] = x2 + z                                   # residual add


def _band_weight(wt_hwio, W, N):
    """(3,3,Cin,Cout) HWIO -> (N*W*C, 3*N*W*C) block-banded weight matrix.

    Column block ky holds A_ky with A_ky[(w+kx-1)*C+ci, w*C+co] = wt[ky,kx,ci,co]
    (entries falling outside [0, W) are simply absent = 'SAME' zero padding in
    the W direction).  The per-image band is block-diagonal over the N images
    packed in the lane axis.
    """
    eye_n = jnp.eye(N, dtype=jnp.float32)
    blocks = []
    for ky in range(3):
        a = None
        for kx in range(3):
            s = jnp.eye(W, W, k=1 - kx, dtype=jnp.float32)
            term = jnp.kron(s, wt_hwio[ky, kx].astype(jnp.float32))
            a = term if a is None else a + term
        blocks.append(jnp.kron(eye_n, a))
    return jnp.concatenate(blocks, axis=1)


@jax.jit
def residual_block(x_nchw, p):
    """Pallas implementation. x_nchw: (N, C, H, W) float32."""
    N, C, H, W = x_nchw.shape
    L = N * W * C                                            # lane dim

    # Lane-dense layout: (N, C, H, W) -> (H, N*W*C), lane = (n*W + w)*C + c.
    # TODO(synk): at model scale, keep activations in this layout across layers
    # instead of paying the NCHW<->(H, N*W*C) relayout on every block.
    x2 = jnp.transpose(x_nchw, (2, 0, 3, 1)).reshape(H, L)

    w1 = _band_weight(p['w1'], W, N)                         # (L, 3L)
    w2 = _band_weight(p['w2'], W, N)                         # (L, 3L)

    # Per-channel averaging matrix: sums the N*W lane groups of each channel
    # and divides by the BatchNorm element count N*H*W.
    pm = (jnp.kron(jnp.ones((N * W, N * W), jnp.float32),
                   jnp.eye(C, dtype=jnp.float32)) / float(N * H * W))  # (L, L)

    lane = lambda v: jnp.tile(v.astype(jnp.float32), N * W)  # (C,) -> (L,)
    rows = jnp.stack([lane(p['b1']), lane(p['g1']), lane(p['be1']),
                      lane(p['b2']), lane(p['g2']), lane(p['be2'])], axis=0)

    alpha = jnp.reshape(jnp.asarray(p['alpha'], jnp.float32), (1,))

    out2 = pl.pallas_call(
        residual_block_kernel,
        out_shape=jax.ShapeDtypeStruct((H, L), jnp.float32),
        in_specs=[pl.BlockSpec(memory_space=pltpu.MemorySpace.VMEM)] * 5
                 + [pl.BlockSpec(memory_space=pltpu.MemorySpace.SMEM)],
        out_specs=pl.BlockSpec(memory_space=pltpu.MemorySpace.VMEM),
        compiler_params=pltpu.CompilerParams(vmem_limit_bytes=48 * 1024 * 1024),
    )(x2, w1, w2, pm, rows, alpha)

    # TODO(synk): for larger H*W, tile the row axis with a +/-1-row halo and a
    # two-pass BatchNorm (partial s1/s2 then normalize) so the kernel pipelines
    # over a grid and, on v7x, splits across both TensorCores.
    return jnp.transpose(out2.reshape(H, N, W, C), (1, 3, 0, 2))


def residual_block_ref(x_nchw, p):
    """Pure-JAX reference (high-precision conv), same training-mode BN math."""
    x = jnp.transpose(x_nchw, (0, 2, 3, 1))

    def conv(v, w, b):
        return lax.conv_general_dilated(
            v, w, (1, 1), 'SAME',
            dimension_numbers=('NHWC', 'HWIO', 'NHWC'),
            precision=lax.Precision.HIGHEST) + b.reshape(1, 1, 1, -1)

    def bn(v, g, b):
        mean = jnp.mean(v, axis=(0, 1, 2), keepdims=True)
        var = jnp.mean((v - mean) ** 2, axis=(0, 1, 2), keepdims=True)
        return (v - mean) * lax.rsqrt(var + EPS) * g.reshape(1, 1, 1, -1) \
            + b.reshape(1, 1, 1, -1)

    y = conv(x, p['w1'], p['b1'])
    y = bn(y, p['g1'], p['be1'])
    y = jnp.where(y > 0, y, p['alpha'] * y)
    z = conv(y, p['w2'], p['b2'])
    z = bn(z, p['g2'], p['be2'])
    return jnp.transpose(x + z, (0, 3, 1, 2))


if __name__ == "__main__":
    key = jax.random.PRNGKey(0)
    N, C, H, W = 2, 4, 16, 16
    ks = jax.random.split(key, 9)

    x = jax.random.normal(ks[0], (N, C, H, W), jnp.float32)

    # Deterministic synthetic parameters (conv weights in HWIO layout).
    params = dict(
        w1=0.1 * jax.random.normal(ks[1], (3, 3, C, C), jnp.float32),
        b1=0.1 * jax.random.normal(ks[2], (C,), jnp.float32),
        g1=1.0 + 0.1 * jax.random.normal(ks[3], (C,), jnp.float32),
        be1=0.1 * jax.random.normal(ks[4], (C,), jnp.float32),
        alpha=jnp.float32(0.25),                      # PReLU default init
        w2=0.1 * jax.random.normal(ks[5], (3, 3, C, C), jnp.float32),
        b2=0.1 * jax.random.normal(ks[6], (C,), jnp.float32),
        g2=1.0 + 0.05 * jax.random.normal(ks[7], (C,), jnp.float32),
        be2=0.05 * jax.random.normal(ks[8], (C,), jnp.float32),
    )

    out = jax.block_until_ready(residual_block(x, params))
    ref = residual_block_ref(x, params)

    assert out.shape == x.shape
    max_err = float(jnp.max(jnp.abs(out - ref)))
    # Conv matmuls run at default MXU precision (per the perf review), so allow
    # bf16-level deviation from the HIGHEST-precision f32 reference.
    assert max_err < 5e-2, f"max abs error too large: {max_err}"

    print("KERNEL_OK")
</pallas_src>

<mosaic_0001>
module attributes {stable_mosaic.version = 11 : i64} {
  func.func @residual_block_kernel(%arg0: memref<16x128xf32, #tpu.memory_space<vmem>>, %arg1: memref<128x384xf32, #tpu.memory_space<vmem>>, %arg2: memref<128x384xf32, #tpu.memory_space<vmem>>, %arg3: memref<128x128xf32, #tpu.memory_space<vmem>>, %arg4: memref<6x128xf32, #tpu.memory_space<vmem>>, %arg5: memref<1xf32, #tpu.memory_space<smem>>, %arg6: memref<16x128xf32, #tpu.memory_space<vmem>>) attributes {dimension_semantics = [], scalar_prefetch = 0 : i64, scratch_operands = 0 : i64, tpu.core_type = #tpu.core_type<tc>} {
    %c0 = arith.constant 0 : index
    %c0_0 = arith.constant 0 : index
    %0 = vector.load %arg0[%c0, %c0_0] : memref<16x128xf32, #tpu.memory_space<vmem>>, vector<16x128xf32>
    %1 = tpu.iota {dimensions = array<i32: 0>} : vector<16x1xi32>
    %c0_i32 = arith.constant 0 : i32
    %2 = vector.broadcast %c0_i32 : i32 to vector<16x1xi32>
    %3 = arith.cmpi ne, %1, %2 : vector<16x1xi32>
    %4 = arith.extui %3 : vector<16x1xi1> to vector<16x1xi32>
    %5 = arith.sitofp %4 : vector<16x1xi32> to vector<16x1xf32>
    %c15_i32 = arith.constant 15 : i32
    %6 = vector.broadcast %c15_i32 : i32 to vector<16x1xi32>
    %7 = arith.cmpi ne, %1, %6 : vector<16x1xi32>
    %8 = arith.extui %7 : vector<16x1xi1> to vector<16x1xi32>
    %9 = arith.sitofp %8 : vector<16x1xi32> to vector<16x1xf32>
    %c0_1 = arith.constant 0 : index
    %c0_2 = arith.constant 0 : index
    %10 = vector.load %arg4[%c0_1, %c0_2] : memref<6x128xf32, #tpu.memory_space<vmem>>, vector<1x128xf32>
    %c1 = arith.constant 1 : index
    %c0_3 = arith.constant 0 : index
    %11 = vector.load %arg4[%c1, %c0_3] : memref<6x128xf32, #tpu.memory_space<vmem>>, vector<1x128xf32>
    %c2 = arith.constant 2 : index
    %c0_4 = arith.constant 0 : index
    %12 = vector.load %arg4[%c2, %c0_4] : memref<6x128xf32, #tpu.memory_space<vmem>>, vector<1x128xf32>
    %c3 = arith.constant 3 : index
    %c0_5 = arith.constant 0 : index
    %13 = vector.load %arg4[%c3, %c0_5] : memref<6x128xf32, #tpu.memory_space<vmem>>, vector<1x128xf32>
    %c4 = arith.constant 4 : index
    %c0_6 = arith.constant 0 : index
    %14 = vector.load %arg4[%c4, %c0_6] : memref<6x128xf32, #tpu.memory_space<vmem>>, vector<1x128xf32>
    %c5 = arith.constant 5 : index
    %c0_7 = arith.constant 0 : index
    %15 = vector.load %arg4[%c5, %c0_7] : memref<6x128xf32, #tpu.memory_space<vmem>>, vector<1x128xf32>
    %c0_8 = arith.constant 0 : index
    %c0_9 = arith.constant 0 : index
    %16 = vector.load %arg1[%c0_8, %c0_9] : memref<128x384xf32, #tpu.memory_space<vmem>>, vector<128x384xf32>
    %cst = arith.constant dense<0.000000e+00> : vector<16x384xf32>
    %17 = tpu.matmul %0, %16, %cst {dimension_numbers = #tpu.dot_dimension_numbers<[1], [0], [0], [1], [0, 0, 1, 1], [], []>} : vector<16x128xf32>, vector<128x384xf32>, vector<16x384xf32> -> vector<16x384xf32>
    %18 = vector.extract_strided_slice %17 {offsets = [0, 0], sizes = [16, 128], strides = [1, 1]} : vector<16x384xf32> to vector<16x128xf32>
    %19 = vector.extract_strided_slice %17 {offsets = [0, 128], sizes = [16, 128], strides = [1, 1]} : vector<16x384xf32> to vector<16x128xf32>
    %20 = vector.extract_strided_slice %17 {offsets = [0, 256], sizes = [16, 128], strides = [1, 1]} : vector<16x384xf32> to vector<16x128xf32>
    %c1_i32 = arith.constant 1 : i32
    %21 = tpu.dynamic_rotate %18 by %c1_i32 dim 0 : vector<16x128xf32>, i32 -> vector<16x128xf32>
    %22 = vector.broadcast %5 : vector<16x1xf32> to vector<16x128xf32>
    %23 = arith.mulf %21, %22 : vector<16x128xf32>
    %c15_i32_10 = arith.constant 15 : i32
    %24 = tpu.dynamic_rotate %20 by %c15_i32_10 dim 0 : vector<16x128xf32>, i32 -> vector<16x128xf32>
    %25 = vector.broadcast %9 : vector<16x1xf32> to vector<16x128xf32>
    %26 = arith.mulf %24, %25 : vector<16x128xf32>
    %27 = arith.addf %19, %23 : vector<16x128xf32>
    %28 = arith.addf %27, %26 : vector<16x128xf32>
    %29 = vector.broadcast %10 : vector<1x128xf32> to vector<16x128xf32>
    %30 = arith.addf %28, %29 : vector<16x128xf32>
    %cst_11 = arith.constant dense<0.000000e+00> : vector<128xf32>
    %31 = vector.multi_reduction <add>, %30, %cst_11 [0] : vector<16x128xf32> to vector<128xf32>
    %32 = vector.shape_cast %31 : vector<128xf32> to vector<1x128xf32>
    %33 = arith.mulf %30, %30 : vector<16x128xf32>
    %cst_12 = arith.constant dense<0.000000e+00> : vector<128xf32>
    %34 = vector.multi_reduction <add>, %33, %cst_12 [0] : vector<16x128xf32> to vector<128xf32>
    %35 = vector.shape_cast %34 : vector<128xf32> to vector<1x128xf32>
    %36 = tpu.concatenate %32, %35 in 0 : vector<1x128xf32>, vector<1x128xf32> -> vector<2x128xf32>
    %c0_13 = arith.constant 0 : index
    %c0_14 = arith.constant 0 : index
    %37 = vector.load %arg3[%c0_13, %c0_14] : memref<128x128xf32, #tpu.memory_space<vmem>>, vector<128x128xf32>
    %cst_15 = arith.constant dense<0.000000e+00> : vector<2x128xf32>
    %38 = tpu.matmul %36, %37, %cst_15 {dimension_numbers = #tpu.dot_dimension_numbers<[1], [0], [0], [1], [0, 0, 1, 1], [], []>} : vector<2x128xf32>, vector<128x128xf32>, vector<2x128xf32> -> vector<2x128xf32>
    %39 = vector.extract_strided_slice %38 {offsets = [0, 0], sizes = [1, 128], strides = [1, 1]} : vector<2x128xf32> to vector<1x128xf32>
    %40 = vector.extract_strided_slice %38 {offsets = [1, 0], sizes = [1, 128], strides = [1, 1]} : vector<2x128xf32> to vector<1x128xf32>
    %41 = arith.mulf %39, %39 : vector<1x128xf32>
    %42 = arith.subf %40, %41 : vector<1x128xf32>
    %cst_16 = arith.constant 9.99999974E-6 : f32
    %43 = vector.broadcast %cst_16 : f32 to vector<1x128xf32>
    %44 = arith.addf %42, %43 : vector<1x128xf32>
    %45 = math.rsqrt %44 : vector<1x128xf32>
    %46 = arith.mulf %11, %45 : vector<1x128xf32>
    %47 = arith.mulf %39, %46 : vector<1x128xf32>
    %48 = arith.subf %12, %47 : vector<1x128xf32>
    %49 = vector.broadcast %46 : vector<1x128xf32> to vector<16x128xf32>
    %50 = arith.mulf %30, %49 : vector<16x128xf32>
    %51 = vector.broadcast %48 : vector<1x128xf32> to vector<16x128xf32>
    %52 = arith.addf %50, %51 : vector<16x128xf32>
    %c0_17 = arith.constant 0 : index
    %53 = memref.load %arg5[%c0_17] : memref<1xf32, #tpu.memory_space<smem>>
    %cst_18 = arith.constant 0.000000e+00 : f32
    %54 = vector.broadcast %cst_18 : f32 to vector<16x128xf32>
    %55 = arith.cmpf ogt, %52, %54 : vector<16x128xf32>
    %56 = vector.broadcast %53 : f32 to vector<16x128xf32>
    %57 = arith.mulf %56, %52 : vector<16x128xf32>
    %58 = arith.select %55, %52, %57 : vector<16x128xi1>, vector<16x128xf32>
    %c0_19 = arith.constant 0 : index
    %c0_20 = arith.constant 0 : index
    %59 = vector.load %arg2[%c0_19, %c0_20] : memref<128x384xf32, #tpu.memory_space<vmem>>, vector<128x384xf32>
    %cst_21 = arith.constant dense<0.000000e+00> : vector<16x384xf32>
    %60 = tpu.matmul %58, %59, %cst_21 {dimension_numbers = #tpu.dot_dimension_numbers<[1], [0], [0], [1], [0, 0, 1, 1], [], []>} : vector<16x128xf32>, vector<128x384xf32>, vector<16x384xf32> -> vector<16x384xf32>
    %61 = vector.extract_strided_slice %60 {offsets = [0, 0], sizes = [16, 128], strides = [1, 1]} : vector<16x384xf32> to vector<16x128xf32>
    %62 = vector.extract_strided_slice %60 {offsets = [0, 128], sizes = [16, 128], strides = [1, 1]} : vector<16x384xf32> to vector<16x128xf32>
    %63 = vector.extract_strided_slice %60 {offsets = [0, 256], sizes = [16, 128], strides = [1, 1]} : vector<16x384xf32> to vector<16x128xf32>
    %c1_i32_22 = arith.constant 1 : i32
    %64 = tpu.dynamic_rotate %61 by %c1_i32_22 dim 0 : vector<16x128xf32>, i32 -> vector<16x128xf32>
    %65 = vector.broadcast %5 : vector<16x1xf32> to vector<16x128xf32>
    %66 = arith.mulf %64, %65 : vector<16x128xf32>
    %c15_i32_23 = arith.constant 15 : i32
    %67 = tpu.dynamic_rotate %63 by %c15_i32_23 dim 0 : vector<16x128xf32>, i32 -> vector<16x128xf32>
    %68 = vector.broadcast %9 : vector<16x1xf32> to vector<16x128xf32>
    %69 = arith.mulf %67, %68 : vector<16x128xf32>
    %70 = arith.addf %62, %66 : vector<16x128xf32>
    %71 = arith.addf %70, %69 : vector<16x128xf32>
    %72 = vector.broadcast %13 : vector<1x128xf32> to vector<16x128xf32>
    %73 = arith.addf %71, %72 : vector<16x128xf32>
    %cst_24 = arith.constant dense<0.000000e+00> : vector<128xf32>
    %74 = vector.multi_reduction <add>, %73, %cst_24 [0] : vector<16x128xf32> to vector<128xf32>
    %75 = vector.shape_cast %74 : vector<128xf32> to vector<1x128xf32>
    %76 = arith.mulf %73, %73 : vector<16x128xf32>
    %cst_25 = arith.constant dense<0.000000e+00> : vector<128xf32>
    %77 = vector.multi_reduction <add>, %76, %cst_25 [0] : vector<16x128xf32> to vector<128xf32>
    %78 = vector.shape_cast %77 : vector<128xf32> to vector<1x128xf32>
    %79 = tpu.concatenate %75, %78 in 0 : vector<1x128xf32>, vector<1x128xf32> -> vector<2x128xf32>
    %c0_26 = arith.constant 0 : index
    %c0_27 = arith.constant 0 : index
    %80 = vector.load %arg3[%c0_26, %c0_27] : memref<128x128xf32, #tpu.memory_space<vmem>>, vector<128x128xf32>
    %cst_28 = arith.constant dense<0.000000e+00> : vector<2x128xf32>
    %81 = tpu.matmul %79, %80, %cst_28 {dimension_numbers = #tpu.dot_dimension_numbers<[1], [0], [0], [1], [0, 0, 1, 1], [], []>} : vector<2x128xf32>, vector<128x128xf32>, vector<2x128xf32> -> vector<2x128xf32>
    %82 = vector.extract_strided_slice %81 {offsets = [0, 0], sizes = [1, 128], strides = [1, 1]} : vector<2x128xf32> to vector<1x128xf32>
    %83 = vector.extract_strided_slice %81 {offsets = [1, 0], sizes = [1, 128], strides = [1, 1]} : vector<2x128xf32> to vector<1x128xf32>
    %84 = arith.mulf %82, %82 : vector<1x128xf32>
    %85 = arith.subf %83, %84 : vector<1x128xf32>
    %cst_29 = arith.constant 9.99999974E-6 : f32
    %86 = vector.broadcast %cst_29 : f32 to vector<1x128xf32>
    %87 = arith.addf %85, %86 : vector<1x128xf32>
    %88 = math.rsqrt %87 : vector<1x128xf32>
    %89 = arith.mulf %14, %88 : vector<1x128xf32>
    %90 = arith.mulf %82, %89 : vector<1x128xf32>
    %91 = arith.subf %15, %90 : vector<1x128xf32>
    %92 = vector.broadcast %89 : vector<1x128xf32> to vector<16x128xf32>
    %93 = arith.mulf %73, %92 : vector<16x128xf32>
    %94 = vector.broadcast %91 : vector<1x128xf32> to vector<16x128xf32>
    %95 = arith.addf %93, %94 : vector<16x128xf32>
    %96 = arith.addf %0, %95 : vector<16x128xf32>
    %c0_30 = arith.constant 0 : index
    %c0_31 = arith.constant 0 : index
    %97 = vector.load %arg6[%c0_30, %c0_31] : memref<16x128xf32, #tpu.memory_space<vmem>>, vector<16x128xf32>
    tpu.vector_store %arg6[%c0_30, %c0_31], %96 {strides = array<i32>} : memref<16x128xf32, #tpu.memory_space<vmem>>, vector<16x128xf32>,
    return
  }
}

</mosaic_0001>

<bundles_post_ra>
// kernel: tile.33
= control target key start
LH: loop header
LB: loop body
LE: loop exit
PB: predicated region body
PF: predicated region fallthrough
CT: control target
= control target key end

     0   :  { %s40_s0 = inlined_call_operand.vmem [shape: f32[4], index: 0, kind: input, shape index: {}]   ;;  %s41_s1 = inlined_call_operand.vmem [shape: f32[32,4], index: 1, kind: output, shape index: {}]  }
   0x1   :  { %v4_v0 = vld [vmem:[%s40_s0] ss:$0 sm:$0xff] }
   0x2   :  { %5 = vst [vmem:[%s41_s1] sm:$0xff] %v4_v0 }
   0x3   :  { %12 = vst [vmem:[%s41_s1 + $0x8] sm:$0xff] %v4_v0 }
   0x4   :  { %13 = vst [vmem:[%s41_s1 + $0x10] sm:$0xff] %v4_v0 }
   0x5   :  { %14 = vst [vmem:[%s41_s1 + $0x18] sm:$0xff] %v4_v0 }

// kernel: tile.54
= control target key start
LH: loop header
LB: loop body
LE: loop exit
PB: predicated region body
PF: predicated region fallthrough
CT: control target
= control target key end

     0   :  { %s259_s10 = smov 124   ;;  %s260_s11 = smov 116   ;;  %vm3_vm0 = vcmask 31744   ;;  %vm9_vm1 = vcmask 1048544   ;;  %vm15_vm2 = vcmask 1015744   ;;  %vm21_vm3 = vcmask 982944   ;;  %s399_s0 = inlined_call_operand.vmem [shape: f32[32,4], index: 0, kind: input, shape index: {}]   ;;  %s400_s1 = inlined_call_operand.vmem [shape: f32[1,128], index: 1, kind: output, shape index: {}]  }
   0x1   :  { %v197_v0 = vld [vmem:[%s399_s0 + $0x1f] sm:$0x1]   ;;  %v199_v1 = vld [vmem:[%s399_s0 + $0x1d] sm:$0x1]   ;;  %v201_v2 = vld [vmem:[%s399_s0 + $0x1b] sm:$0x1]  }
   0x2   :  { %7 = vrot.lane.b32.xlu0 %v197_v0, %s259_s10  ;;  %19 = vrot.lane.b32.xlu1 %v199_v1, %s260_s11  ;;  %s261_s14 = smov 108   ;;  %v198_v3 = vld [vmem:[%s399_s0 + $0x1e] sm:$0x1]   ;;  %v200_v4 = vld [vmem:[%s399_s0 + $0x1c] sm:$0x1]   ;;  %s262_s19 = smov 120  }
   0x3   :  { %31 = vrot.lane.b32.xlu2 %v201_v2, %s261_s14  ;;  %s263_s20 = smov 112   ;;  %v202_v5 = vld [vmem:[%s399_s0 + $0x1a] sm:$0x1]   ;;  %s264_s23 = smov 104   ;;  %v203_v6 = vld [vmem:[%s399_s0 + $0x19] sm:$0x1]  }
   0x4   :  { %v204_v7 = vld [vmem:[%s399_s0 + $0x18] sm:$0x1]   ;;  %s265_s28 = smov 100   ;;  %s266_s29 = smov 96   ;;  %v205_v8 = vld [vmem:[%s399_s0 + $0x17] sm:$0x1]  }
   0x5   :  { %s267_s3 = smov 92   ;;  %v206_v9 = vld [vmem:[%s399_s0 + $0x16] sm:$0x1]   ;;  %v207_v10 = vld [vmem:[%s399_s0 + $0x15] sm:$0x1]   ;;  %s268_s8 = smov 88  }
   0x6   :  { %s269_s9 = smov 84   ;;  %v208_v11 = vld [vmem:[%s399_s0 + $0x14] sm:$0x1]   ;;  %s270_s12 = smov 80   ;;  %v209_v12 = vld [vmem:[%s399_s0 + $0x13] sm:$0x1]  }
   0x7   :  { %v210_v13 = vld [vmem:[%s399_s0 + $0x12] sm:$0x1]   ;;  %s271_s17 = smov 76   ;;  %s272_s18 = smov 72   ;;  %v211_v14 = vld [vmem:[%s399_s0 + $0x11] sm:$0x1]  }
   0x8   :  { %s273_s21 = smov 68   ;;  %v212_v15 = vld [vmem:[%s399_s0 + $0x10] sm:$0x1]   ;;  %v213_v16 = vld [vmem:[%s399_s0 + $0xf] sm:$0x1]   ;;  %s274_s26 = smov 64  }
   0x9   :  { %s275_s27 = smov 60   ;;  %v214_v17 = vld [vmem:[%s399_s0 + $0xe] sm:$0x1]   ;;  %s276_s30 = smov 56   ;;  %v215_v18 = vld [vmem:[%s399_s0 + $0xd] sm:$0x1]  }
   0xa   :  { %13 = vrot.lane.b32.xlu0 %v198_v3, %s262_s19  ;;  %25 = vrot.lane.b32.xlu1 %v200_v4, %s263_s20  ;;  %v216_v19 = vld [vmem:[%s399_s0 + $0xc] sm:$0x1]   ;;  %s277_s6 = smov 52   ;;  %s278_s7 = smov 48   ;;  %v217_v20 = vld [vmem:[%s399_s0 + $0xb] sm:$0x1]  }
   0xb   :  { %37 = vrot.lane.b32.xlu2 %v202_v5, %s264_s23  ;;  %s279_s10 = smov 44   ;;  %v218_v21 = vld [vmem:[%s399_s0 + $0xa] sm:$0x1]   ;;  %v219_v22 = vld [vmem:[%s399_s0 + $0x9] sm:$0x1]   ;;  %s280_s15 = smov 40  }
   0xc   :  { %s281_s16 = smov 36   ;;  %v220_v23 = vld [vmem:[%s399_s0 + $0x8] sm:$0x1]   ;;  %s282_s19 = smov 32   ;;  %v221_v24 = vld [vmem:[%s399_s0 + $0x7] sm:$0x1]  }
   0xd   :  { %v222_v25 = vld [vmem:[%s399_s0 + $0x6] sm:$0x1]   ;;  %s283_s24 = smov 28   ;;  %s284_s25 = smov 24   ;;  %v223_v26 = vld [vmem:[%s399_s0 + $0x5] sm:$0x1]  }
   0xe   :  { %v224_v27 = vld [vmem:[%s399_s0 + $0x4] sm:$0x1]   ;;  %v225_v28 = vld [vmem:[%s399_s0 + $0x3] sm:$0x1]   ;;  %s286_s4 = smov 16   ;;  %s287_s5 = smov 12  }
   0xf   :  { %v226_v29 = vld [vmem:[%s399_s0 + $0x2] sm:$0x1]   ;;  %v227_v30 = vld [vmem:[%s399_s0 + $0x1] sm:$0x1]   ;;  %s289_s11 = smov 4   ;;  %vm27_vm4 = vcmask 950144  }
  0x10   :  { %v2_v31 = vld [vmem:[%s399_s0] sm:$0x1]   ;;  %vm33_vm5 = vcmask 917344   ;;  %vm39_vm6 = vcmask 884544   ;;  %vm45_vm7 = vcmask 851744   ;;  %vm51_vm8 = vcmask 818944  }
  0x11   :  { %4 = vst.msk [vmem:[#allocation0] sm:$0x1] %vm3_vm0, %v2_v31   ;;  %vm57_vm9 = vcmask 786144   ;;  %vm63_vm10 = vcmask 753344   ;;  %vm69_vm11 = vcmask 720544   ;;  %vm75_vm12 = vcmask 687744  }
  0x12   :  { %43 = vrot.lane.b32.xlu0 %v203_v6, %s265_s28  ;;  %49 = vrot.lane.b32.xlu1 %v204_v7, %s266_s29  ;;  %s285_s28 = smov 20   ;;  %vm81_vm13 = vcmask 654944   ;;  %vm87_vm14 = vcmask 622144   ;;  %vm93_vm15 = vcmask 589344   ;;  %vm99_vm0 = vcmask 556544  }
  0x13   :  { %55 = vrot.lane.b32.xlu2 %v205_v8, %s267_s3 }
  0x1a   :  { %61 = vrot.lane.b32.xlu0 %v206_v9, %s268_s8  ;;  %67 = vrot.lane.b32.xlu1 %v207_v10, %s269_s9  ;;  %s288_s8 = smov 8  }
  0x1b   :  { %73 = vrot.lane.b32.xlu2 %v208_v11, %s270_s12 }
  0x22   :  { %79 = vrot.lane.b32.xlu0 %v209_v12, %s271_s17  ;;  %85 = vrot.lane.b32.xlu1 %v210_v13, %s272_s18 }
  0x23   :  { %91 = vrot.lane.b32.xlu2 %v211_v14, %s273_s21 }
  0x2a   :  { %97 = vrot.lane.b32.xlu0 %v212_v15, %s274_s26  ;;  %103 = vrot.lane.b32.xlu1 %v213_v16, %s275_s27 }
  0x2b   :  { %109 = vrot.lane.b32.xlu2 %v214_v17, %s276_s30 }
  0x32   :  { %115 = vrot.lane.b32.xlu0 %v215_v18, %s277_s6  ;;  %121 = vrot.lane.b32.xlu1 %v216_v19, %s278_s7 }
  0x33   :  { %127 = vrot.lane.b32.xlu2 %v217_v20, %s279_s10 }
  0x3a   :  { %133 = vrot.lane.b32.xlu0 %v218_v21, %s280_s15  ;;  %139 = vrot.lane.b32.xlu1 %v219_v22, %s281_s16 }
  0x3b   :  { %145 = vrot.lane.b32.xlu2 %v220_v23, %s282_s19 }
  0x42   :  { %151 = vrot.lane.b32.xlu0 %v221_v24, %s283_s24  ;;  %157 = vrot.lane.b32.xlu1 %v222_v25, %s284_s25 }
  0x43   :  { %163 = vrot.lane.b32.xlu2 %v223_v26, %s285_s28 }
  0x4a   :  { %169 = vrot.lane.b32.xlu0 %v224_v27, %s286_s4  ;;  %175 = vrot.lane.b32.xlu1 %v225_v28, %s287_s5 }
  0x4b   :  { %181 = vrot.lane.b32.xlu2 %v226_v29, %s288_s8 }
  0x52   :  { %187 = vrot.lane.b32.xlu0 %v227_v30, %s289_s11 }
  0x5d   :  { %v32_v32 = vpop.permute.xlu2 %31  }
  0x65   :  { %v38_v33 = vpop.permute.xlu2 %37  }
  0x6d   :  { %v56_v34 = vpop.permute.xlu2 %55  }
  0x74   :  { %v8_v35 = vpop.permute.xlu0 %7   ;;  %v20_v36 = vpop.permute.xlu1 %19  }
  0x75   :  { %10 = vst.msk [vmem:[#allocation0] sm:$0x1] %vm9_vm1, %v8_v35   ;;  %v74_v37 = vpop.permute.xlu2 %73   ;;  %vm105_vm1 = vcmask 523744  }
  0x7c   :  { %v14_v38 = vpop.permute.xlu0 %13   ;;  %v26_v39 = vpop.permute.xlu1 %25  }
  0x7d   :  { %16 = vst.msk [vmem:[#allocation0] sm:$0x1] %vm15_vm2, %v14_v38   ;;  %v92_v40 = vpop.permute.xlu2 %91   ;;  %vm111_vm2 = vcmask 490944  }
  0x7e   :  { %22 = vst.msk [vmem:[#allocation0] sm:$0x1] %vm21_vm3, %v20_v36   ;;  %vm117_vm3 = vcmask 458144  }
  0x7f   :  { %28 = vst.msk [vmem:[#allocation0] sm:$0x1] %vm27_vm4, %v26_v39   ;;  %vm123_vm4 = vcmask 425344  }
  0x80   :  { %34 = vst.msk [vmem:[#allocation0] sm:$0x1] %vm33_vm5, %v32_v32   ;;  %vm129_vm5 = vcmask 392544  }
  0x81   :  { %40 = vst.msk [vmem:[#allocation0] sm:$0x1] %vm39_vm6, %v38_v33   ;;  %vm135_vm6 = vcmask 359744  }
  0x84   :  { %v44_v41 = vpop.permute.xlu0 %43   ;;  %v50_v42 = vpop.permute.xlu1 %49  }
  0x85   :  { %46 = vst.msk [vmem:[#allocation0] sm:$0x1] %vm45_vm7, %v44_v41   ;;  %v110_v43 = vpop.permute.xlu2 %109   ;;  %vm141_vm7 = vcmask 326944  }
  0x86   :  { %52 = vst.msk [vmem:[#allocation0] sm:$0x1] %vm51_vm8, %v50_v42   ;;  %vm147_vm8 = vcmask 294144  }
  0x87   :  { %58 = vst.msk [vmem:[#allocation0] sm:$0x1] %vm57_vm9, %v56_v34   ;;  %vm153_vm9 = vcmask 261344  }
  0x8c   :  { %v62_v44 = vpop.permute.xlu0 %61   ;;  %v68_v45 = vpop.permute.xlu1 %67  }
  0x8d   :  { %64 = vst.msk [vmem:[#allocation0] sm:$0x1] %vm63_vm10, %v62_v44   ;;  %v128_v46 = vpop.permute.xlu2 %127   ;;  %vm159_vm10 = vcmask 228544  }
  0x8e   :  { %70 = vst.msk [vmem:[#allocation0] sm:$0x1] %vm69_vm11, %v68_v45   ;;  %vm165_vm11 = vcmask 195744  }
  0x8f   :  { %76 = vst.msk [vmem:[#allocation0] sm:$0x1] %vm75_vm12, %v74_v37   ;;  %vm171_vm12 = vcmask 162944  }
  0x94   :  { %v80_v47 = vpop.permute.xlu0 %79   ;;  %v86_v48 = vpop.permute.xlu1 %85  }
  0x95   :  { %82 = vst.msk [vmem:[#allocation0] sm:$0x1] %vm81_vm13, %v80_v47   ;;  %v146_v49 = vpop.permute.xlu2 %145   ;;  %vm177_vm13 = vcmask 130144  }
  0x96   :  { %88 = vst.msk [vmem:[#allocation0] sm:$0x1] %vm87_vm14, %v86_v48   ;;  %vm183_vm14 = vcmask 97344  }
  0x97   :  { %94 = vst.msk [vmem:[#allocation0] sm:$0x1] %vm93_vm15, %v92_v40   ;;  %vm189_vm15 = vcmask 64544  }
  0x9c   :  { %v98_v50 = vpop.permute.xlu0 %97   ;;  %v104_v51 = vpop.permute.xlu1 %103  }
  0x9d   :  { %100 = vst.msk [vmem:[#allocation0] sm:$0x1] %vm99_vm0, %v98_v50   ;;  %v164_v52 = vpop.permute.xlu2 %163  }
  0x9e   :  { %106 = vst.msk [vmem:[#allocation0] sm:$0x1] %vm105_vm1, %v104_v51  }
  0x9f   :  { %112 = vst.msk [vmem:[#allocation0] sm:$0x1] %vm111_vm2, %v110_v43  }
  0xa4   :  { %v116_v53 = vpop.permute.xlu0 %115   ;;  %v122_v54 = vpop.permute.xlu1 %121  }
  0xa5   :  { %118 = vst.msk [vmem:[#allocation0] sm:$0x1] %vm117_vm3, %v116_v53   ;;  %v182_v55 = vpop.permute.xlu2 %181  }
  0xa6   :  { %124 = vst.msk [vmem:[#allocation0] sm:$0x1] %vm123_vm4, %v122_v54  }
  0xa7   :  { %130 = vst.msk [vmem:[#allocation0] sm:$0x1] %vm129_vm5, %v128_v46  }
  0xac   :  { %v134_v56 = vpop.permute.xlu0 %133   ;;  %v140_v57 = vpop.permute.xlu1 %139  }
  0xad   :  { %136 = vst.msk [vmem:[#allocation0] sm:$0x1] %vm135_vm6, %v134_v56  }
  0xae   :  { %142 = vst.msk [vmem:[#allocation0] sm:$0x1] %vm141_vm7, %v140_v57  }
  0xaf   :  { %148 = vst.msk [vmem:[#allocation0] sm:$0x1] %vm147_vm8, %v146_v49  }
  0xb4   :  { %v152_v58 = vpop.permute.xlu0 %151   ;;  %v158_v59 = vpop.permute.xlu1 %157  }
  0xb5   :  { %154 = vst.msk [vmem:[#allocation0] sm:$0x1] %vm153_vm9, %v152_v58  }
  0xb6   :  { %160 = vst.msk [vmem:[#allocation0] sm:$0x1] %vm159_vm10, %v158_v59  }
  0xb7   :  { %166 = vst.msk [vmem:[#allocation0] sm:$0x1] %vm165_vm11, %v164_v52  }
  0xbc   :  { %v170_v60 = vpop.permute.xlu0 %169   ;;  %v176_v61 = vpop.permute.xlu1 %175  }
  0xbd   :  { %172 = vst.msk [vmem:[#allocation0] sm:$0x1] %vm171_vm12, %v170_v60  }
  0xbe   :  { %178 = vst.msk [vmem:[#allocation0] sm:$0x1] %vm177_vm13, %v176_v61  }
  0xbf   :  { %184 = vst.msk [vmem:[#allocation0] sm:$0x1] %vm183_vm14, %v182_v55  }
  0xc4   :  { %v188_v62 = vpop.permute.xlu0 %187  }
  0xc5   :  { %190 = vst.msk [vmem:[#allocation0] sm:$0x1] %vm189_vm15, %v188_v62  }
  0xcc   :  { %v193_v63 = vld [vmem:[#allocation0] sm:$0x1] }
  0xcd   :  { %196 = vst [vmem:[%s400_s1] sm:$0x1] %v193_v63 }

// kernel: residual_block.1
= control target key start
LH: loop header
LB: loop body
LE: loop exit
PB: predicated region body
PF: predicated region fallthrough
CT: control target
= control target key end

     0   :  { %v26_v62 = vlaneseq  ;;  %vm201_vm4 = vcmask 1040384   ;;  %s974_s1 = inlined_call_operand.vmem [shape: f32[128,384], index: 1, kind: input, shape index: {}]   ;;  %s975_s0 = inlined_call_operand.vmem [shape: f32[16,128], index: 0, kind: input, shape index: {}]   ;;  %s976_s4 = inlined_call_operand.vmem [shape: f32[6,128], index: 4, kind: input, shape index: {}]   ;;  %s977_s3 = inlined_call_operand.vmem [shape: f32[128,128], index: 3, kind: input, shape index: {}]   ;;  %s978_s2 = inlined_call_operand.vmem [shape: f32[128,384], index: 2, kind: input, shape index: {}]   ;;  %s979_s5 = inlined_call_operand.<no memory space> [shape: f32[1], index: 5, kind: input, shape index: {}]   ;;  %s980_s6 = inlined_call_operand.vmem [shape: f32[16,128], index: 6, kind: output, shape index: {}]  }
   0x1   :  { %v92_v0 = vld [vmem:[%s974_s1 + $0x168] sm:$0xff]  ;;  %v94_v1 = vld [vmem:[%s974_s1 + $0x178] sm:$0xff]  ;;  %v89_v2 = vld [vmem:[%s974_s1 + $0x150] sm:$0xff] }
   0x2   :  { %95 = vmatpush.msra.mxu0 %v92_v0  ;;  %141 = vmatpush.msra.mxu2 %v94_v1  ;;  %v91_v3 = vld [vmem:[%s974_s1 + $0x160] sm:$0xff]  ;;  %v93_v4 = vld [vmem:[%s974_s1 + $0x170] sm:$0xff]  ;;  %v86_v5 = vld [vmem:[%s974_s1 + $0x138] sm:$0xff] }
   0x3   :  { %118 = vmatpush.msra.mxu1 %v93_v4  ;;  %v88_v6 = vld [vmem:[%s974_s1 + $0x148] sm:$0xff]  ;;  %v90_v7 = vld [vmem:[%s974_s1 + $0x158] sm:$0xff]  ;;  %v87_v8 = vld [vmem:[%s974_s1 + $0x140] sm:$0xff] }
   0x4   :  { %96 = vmatpush.msra.mxu0 %v89_v2  ;;  %142 = vmatpush.msra.mxu2 %v91_v3  ;;  %v83_v9 = vld [vmem:[%s974_s1 + $0x120] sm:$0xff]  ;;  %v85_v10 = vld [vmem:[%s974_s1 + $0x130] sm:$0xff]  ;;  %v84_v11 = vld [vmem:[%s974_s1 + $0x128] sm:$0xff]  ;;  %v738_v2 = vshrl.u32 %v26_v62, 7 }
   0x5   :  { %119 = vmatpush.msra.mxu1 %v90_v7  ;;  %v80_v12 = vld [vmem:[%s974_s1 + $0x108] sm:$0xff]  ;;  %v82_v13 = vld [vmem:[%s974_s1 + $0x118] sm:$0xff]  ;;  %v81_v14 = vld [vmem:[%s974_s1 + $0x110] sm:$0xff] }
   0x6   :  { %97 = vmatpush.msra.mxu0 %v86_v5  ;;  %143 = vmatpush.msra.mxu2 %v88_v6  ;;  %v77_v15 = vld [vmem:[%s974_s1 + $0xf0] sm:$0xff]  ;;  %v79_v16 = vld [vmem:[%s974_s1 + $0x100] sm:$0xff]  ;;  %v78_v17 = vld [vmem:[%s974_s1 + $0xf8] sm:$0xff]  ;;  %vm29_vm0 = vcmp.ne.s32.totalorder %v738_v2, 0  ;;  %vm166_vm1 = vcmp.lt.s32.totalorder %v738_v2, 1  ;;  %vm173_vm3 = vcmp.lt.s32.totalorder %v738_v2, 7 }
   0x7   :  { %120 = vmatpush.msra.mxu1 %v87_v8  ;;  %v74_v18 = vld [vmem:[%s974_s1 + $0xd8] sm:$0xff]  ;;  %v76_v19 = vld [vmem:[%s974_s1 + $0xe8] sm:$0xff]  ;;  %v75_v20 = vld [vmem:[%s974_s1 + $0xe0] sm:$0xff]  ;;  %v28_v8 = vadd.s32 8, %v738_v2 }
   0x8   :  { %98 = vmatpush.msra.mxu0 %v83_v9  ;;  %144 = vmatpush.msra.mxu2 %v85_v10  ;;  %v71_v21 = vld [vmem:[%s974_s1 + $0xc0] sm:$0xff]  ;;  %v73_v22 = vld [vmem:[%s974_s1 + $0xd0] sm:$0xff]  ;;  %v72_v23 = vld [vmem:[%s974_s1 + $0xc8] sm:$0xff]  ;;  %v493_v10 = vmov 0.0  }
   0x9   :  { %121 = vmatpush.msra.mxu1 %v84_v11  ;;  %v68_v24 = vld [vmem:[%s974_s1 + $0xa8] sm:$0xff]  ;;  %v70_v25 = vld [vmem:[%s974_s1 + $0xb8] sm:$0xff]  ;;  %v69_v26 = vld [vmem:[%s974_s1 + $0xb0] sm:$0xff]  ;;  %v757_v11 = vsel %vm29_vm0, 1.0, %v493_v10  ;;  %vm36_vm2 = vcmp.ne.s32.totalorder %v28_v8, 15 }
   0xa   :  { %99 = vmatpush.msra.mxu0 %v80_v12  ;;  %145 = vmatpush.msra.mxu2 %v82_v13  ;;  %v65_v27 = vld [vmem:[%s974_s1 + $0x90] sm:$0xff]  ;;  %v67_v28 = vld [vmem:[%s974_s1 + $0xa0] sm:$0xff]  ;;  %v66_v29 = vld [vmem:[%s974_s1 + $0x98] sm:$0xff] }
   0xb   :  { %122 = vmatpush.msra.mxu1 %v81_v14  ;;  %v62_v30 = vld [vmem:[%s974_s1 + $0x78] sm:$0xff]  ;;  %v64_v31 = vld [vmem:[%s974_s1 + $0x88] sm:$0xff]  ;;  %v63_v32 = vld [vmem:[%s974_s1 + $0x80] sm:$0xff] }
   0xc   :  { %100 = vmatpush.msra.mxu0 %v77_v15  ;;  %146 = vmatpush.msra.mxu2 %v79_v16  ;;  %v59_v33 = vld [vmem:[%s974_s1 + $0x60] sm:$0xff]  ;;  %v61_v34 = vld [vmem:[%s974_s1 + $0x70] sm:$0xff]  ;;  %v60_v35 = vld [vmem:[%s974_s1 + $0x68] sm:$0xff] }
   0xd   :  { %123 = vmatpush.msra.mxu1 %v78_v17  ;;  %v56_v36 = vld [vmem:[%s974_s1 + $0x48] sm:$0xff]  ;;  %v58_v37 = vld [vmem:[%s974_s1 + $0x58] sm:$0xff]  ;;  %v57_v38 = vld [vmem:[%s974_s1 + $0x50] sm:$0xff] }
   0xe   :  { %101 = vmatpush.msra.mxu0 %v74_v18  ;;  %147 = vmatpush.msra.mxu2 %v76_v19  ;;  %v53_v39 = vld [vmem:[%s974_s1 + $0x30] sm:$0xff]  ;;  %v55_v40 = vld [vmem:[%s974_s1 + $0x40] sm:$0xff]  ;;  %v54_v41 = vld [vmem:[%s974_s1 + $0x38] sm:$0xff]  ;;  %v765_v19 = vsel %vm36_vm2, 1.0, %v493_v10 }
   0xf   :  { %124 = vmatpush.msra.mxu1 %v75_v20  ;;  %v50_v42 = vld [vmem:[%s974_s1 + $0x18] sm:$0xff]  ;;  %v52_v43 = vld [vmem:[%s974_s1 + $0x28] sm:$0xff]  ;;  %v51_v44 = vld [vmem:[%s974_s1 + $0x20] sm:$0xff] }
  0x10   :  { %102 = vmatpush.msra.mxu0 %v71_v21  ;;  %148 = vmatpush.msra.mxu2 %v73_v22  ;;  %v47_v45 = vld [vmem:[%s974_s1] sm:$0xff]  ;;  %v49_v46 = vld [vmem:[%s974_s1 + $0x10] sm:$0xff]  ;;  %v48_v48 = vld [vmem:[%s974_s1 + $0x8] sm:$0xff] }
  0x11   :  { %125 = vmatpush.msra.mxu1 %v72_v23  ;;  %v673_v47 = vld [vmem:[%s975_s0] sm:$0xff]  ;;  %v684_v49 = vld [vmem:[%s975_s0 + $0x8] sm:$0xff]  ;;  %v218_v50 = vld [vmem:[%s977_s3 + $0x78] sm:$0xff] }
  0x12   :  { %103 = vmatpush.msra.mxu0 %v68_v24  ;;  %149 = vmatpush.msra.mxu2 %v70_v25  ;;  %v217_v51 = vld [vmem:[%s977_s3 + $0x70] sm:$0xff]  ;;  %v216_v52 = vld [vmem:[%s977_s3 + $0x68] sm:$0xff]  ;;  %v215_v53 = vld [vmem:[%s977_s3 + $0x60] sm:$0xff] }
  0x13   :  { %126 = vmatpush.msra.mxu1 %v69_v26  ;;  %219 = vmatpush.msra.mxu3 %v218_v50  ;;  %v214_v54 = vld [vmem:[%s977_s3 + $0x58] sm:$0xff]  ;;  %v213_v55 = vld [vmem:[%s977_s3 + $0x50] sm:$0xff]  ;;  %v212_v56 = vld [vmem:[%s977_s3 + $0x48] sm:$0xff] }
  0x14   :  { %104 = vmatpush.msra.mxu0 %v65_v27  ;;  %150 = vmatpush.msra.mxu2 %v67_v28  ;;  %v211_v57 = vld [vmem:[%s977_s3 + $0x40] sm:$0xff]  ;;  %v210_v58 = vld [vmem:[%s977_s3 + $0x38] sm:$0xff]  ;;  %v209_v59 = vld [vmem:[%s977_s3 + $0x30] sm:$0xff] }
  0x15   :  { %127 = vmatpush.msra.mxu1 %v66_v29  ;;  %220 = vmatpush.msra.mxu3 %v217_v51  ;;  %v208_v60 = vld [vmem:[%s977_s3 + $0x28] sm:$0xff]  ;;  %v725_v61 = vld [vmem:[%s977_s3 + $0x20] sm:$0xff]  ;;  %v730_v63 = vld [vmem:[%s977_s3 + $0x18] sm:$0xff] }
  0x16   :  { %105 = vmatpush.msra.mxu0 %v62_v30  ;;  %151 = vmatpush.msra.mxu2 %v64_v31  ;;  %v736_v1 = vld [vmem:[%s977_s3 + $0x10] sm:$0xff]  ;;  %v744_v3 = vld [vmem:[%s977_s3 + $0x8] sm:$0xff]  ;;  %v750_v5 = vld [vmem:[%s977_s3] sm:$0xff] }
  0x17   :  { %128 = vmatpush.msra.mxu1 %v63_v32  ;;  %221 = vmatpush.msra.mxu3 %v216_v52  ;;  %v487_v22 = vld [vmem:[%s976_s4] ss:$0 sm:$0xff]  ;;  %v308_v62 = vld [vmem:[%s978_s2 + $0x108] sm:$0xff]  ;;  %v301_v10 = vld [vmem:[%s978_s2 + $0xd0] sm:$0xff] }
  0x18   :  { %106 = vmatpush.msra.mxu0 %v59_v33  ;;  %152 = vmatpush.msra.mxu2 %v61_v34  ;;  %v299_v8 = vld [vmem:[%s978_s2 + $0xc0] sm:$0xff] }
  0x19   :  { %129 = vmatpush.msra.mxu1 %v60_v35  ;;  %222 = vmatpush.msra.mxu3 %v215_v53 }
  0x1a   :  { %107 = vmatpush.msra.mxu0 %v56_v36  ;;  %153 = vmatpush.msra.mxu2 %v58_v37 }
  0x1b   :  { %130 = vmatpush.msra.mxu1 %v57_v38  ;;  %223 = vmatpush.msra.mxu3 %v214_v54 }
  0x1c   :  { %108 = vmatpush.msra.mxu0 %v53_v39  ;;  %154 = vmatpush.msra.mxu2 %v55_v40 }
  0x1d   :  { %131 = vmatpush.msra.mxu1 %v54_v41  ;;  %224 = vmatpush.msra.mxu3 %v213_v55 }
  0x1e   :  { %109 = vmatpush.msra.mxu0 %v50_v42  ;;  %155 = vmatpush.msra.mxu2 %v52_v43 }
  0x1f   :  { %132 = vmatpush.msra.mxu1 %v51_v44  ;;  %225 = vmatpush.msra.mxu3 %v212_v56 }
  0x20   :  { %110 = vmatpush.msra.mxu0 %v47_v45  ;;  %156 = vmatpush.msra.mxu2 %v49_v46 }
  0x21   :  { %111 = vmatmul.f32.vlgmr.msra.gmra.mxu0 %v673_v47  ;;  %157 = vmatmul.f32.vlgmr.msra.gmra.mxu2 %v673_v47 }
  0x22   :  { %133 = vmatpush.msra.mxu1 %v48_v48  ;;  %226 = vmatpush.msra.mxu3 %v211_v57 }
  0x23   :  { %134 = vmatmul.f32.vlgmr.msra.gmra.mxu1 %v673_v47 }
  0x24   :  { %227 = vmatpush.msra.mxu3 %v210_v58 }
  0x26   :  { %228 = vmatpush.msra.mxu3 %v209_v59 }
  0x28   :  { %229 = vmatpush.msra.mxu3 %v208_v60 }
  0x29   :  { %114 = vmatmul.f32.gmra.mxu0 %v684_v49  ;;  %160 = vmatmul.f32.gmra.mxu2 %v684_v49 }
  0x2a   :  { %230 = vmatpush.msra.mxu3 %v725_v61 }
  0x2b   :  { %137 = vmatmul.f32.gmra.mxu1 %v684_v49 }
  0x2c   :  { %231 = vmatpush.msra.mxu3 %v730_v63 }
  0x2e   :  { %232 = vmatpush.msra.mxu3 %v736_v1 }
  0x30   :  { %233 = vmatpush.msra.mxu3 %v744_v3 }
  0x32   :  { %234 = vmatpush.msra.mxu3 %v750_v5 }
  0x34   :  { %428 = vmatpush.msrb.mxu3 %v218_v50  ;;  %v320_v50 = vld [vmem:[%s978_s2 + $0x168] sm:$0xff] }
  0x35   :  { %323 = vmatpush.msrb.mxu0 %v320_v50 }
  0x36   :  { %429 = vmatpush.msrb.mxu3 %v217_v51  ;;  %v321_v51 = vld [vmem:[%s978_s2 + $0x170] sm:$0xff] }
  0x37   :  { %346 = vmatpush.msrb.mxu1 %v321_v51 }
  0x38   :  { %430 = vmatpush.msrb.mxu3 %v216_v52  ;;  %v322_v52 = vld [vmem:[%s978_s2 + $0x178] sm:$0xff] }
  0x39   :  { %369 = vmatpush.msrb.mxu2 %v322_v52  ;;  %v42_v52 = vld [vmem:[%s976_s4 + $0x1] sm:$0x1] }
  0x3a   :  { %431 = vmatpush.msrb.mxu3 %v215_v53  ;;  %v317_v53 = vld [vmem:[%s978_s2 + $0x150] sm:$0xff] }
  0x3b   :  { %324 = vmatpush.msrb.mxu0 %v317_v53 }
  0x3c   :  { %432 = vmatpush.msrb.mxu3 %v214_v54  ;;  %v318_v54 = vld [vmem:[%s978_s2 + $0x158] sm:$0xff] }
  0x3d   :  { %347 = vmatpush.msrb.mxu1 %v318_v54 }
  0x3e   :  { %433 = vmatpush.msrb.mxu3 %v213_v55  ;;  %v319_v55 = vld [vmem:[%s978_s2 + $0x160] sm:$0xff] }
  0x3f   :  { %370 = vmatpush.msrb.mxu2 %v319_v55 }
  0x40   :  { %434 = vmatpush.msrb.mxu3 %v212_v56  ;;  %v314_v56 = vld [vmem:[%s978_s2 + $0x138] sm:$0xff] }
  0x41   :  { %325 = vmatpush.msrb.mxu0 %v314_v56  ;;  %v43_v56 = vld [vmem:[%s976_s4 + $0x2] sm:$0x1] }
  0x42   :  { %435 = vmatpush.msrb.mxu3 %v211_v57  ;;  %v315_v57 = vld [vmem:[%s978_s2 + $0x140] sm:$0xff] }
  0x43   :  { %348 = vmatpush.msrb.mxu1 %v315_v57 }
  0x44   :  { %436 = vmatpush.msrb.mxu3 %v210_v58  ;;  %v316_v58 = vld [vmem:[%s978_s2 + $0x148] sm:$0xff] }
  0x45   :  { %371 = vmatpush.msrb.mxu2 %v316_v58 }
  0x46   :  { %437 = vmatpush.msrb.mxu3 %v209_v59  ;;  %v311_v59 = vld [vmem:[%s978_s2 + $0x120] sm:$0xff] }
  0x47   :  { %326 = vmatpush.msrb.mxu0 %v311_v59 }
  0x48   :  { %438 = vmatpush.msrb.mxu3 %v208_v60  ;;  %v312_v60 = vld [vmem:[%s978_s2 + $0x128] sm:$0xff] }
  0x49   :  { %349 = vmatpush.msrb.mxu1 %v312_v60  ;;  %327 = vmatpush.msrb.mxu0 %v308_v62  ;;  %v270_v62 = vstv %s979_s5 }
  0x4a   :  { %439 = vmatpush.msrb.mxu3 %v725_v61  ;;  %v313_v61 = vld [vmem:[%s978_s2 + $0x130] sm:$0xff] }
  0x4b   :  { %372 = vmatpush.msrb.mxu2 %v313_v61 }
  0x4c   :  { %440 = vmatpush.msrb.mxu3 %v730_v63  ;;  %v309_v63 = vld [vmem:[%s978_s2 + $0x110] sm:$0xff] }
  0x4d   :  { %350 = vmatpush.msrb.mxu1 %v309_v63 }
  0x4e   :  { %441 = vmatpush.msrb.mxu3 %v736_v1  ;;  %v305_v1 = vld [vmem:[%s978_s2 + $0xf0] sm:$0xff] }
  0x4f   :  { %328 = vmatpush.msrb.mxu0 %v305_v1 }
  0x50   :  { %442 = vmatpush.msrb.mxu3 %v744_v3  ;;  %v306_v3 = vld [vmem:[%s978_s2 + $0xf8] sm:$0xff] }
  0x51   :  { %351 = vmatpush.msrb.mxu1 %v306_v3 }
  0x52   :  { %443 = vmatpush.msrb.mxu3 %v750_v5  ;;  %v302_v5 = vld [vmem:[%s978_s2 + $0xd8] sm:$0xff] }
  0x53   :  { %329 = vmatpush.msrb.mxu0 %v302_v5 }
  0x55   :  { %330 = vmatpush.msrb.mxu0 %v299_v8 }
  0x9e   :  { %v112_v0 = vpop.f32.mrf.mxu0 }
  0x9f   :  { %v164_v9 = vrot.slane %v112_v0, 7  ;;  %v310_v0 = vld [vmem:[%s978_s2 + $0x118] sm:$0xff] }
  0xa0   :  { %v135_v4 = vpop.f32.mrf.mxu1  ;;  %373 = vmatpush.msrb.mxu2 %v310_v0 }
  0xa4   :  { %v158_v6 = vpop.f32.mrf.mxu2 }
  0xa5   :  { %v171_v16 = vrot.slane %v158_v6, 1  ;;  %v303_v6 = vld [vmem:[%s978_s2 + $0xe0] sm:$0xff] }
  0xa6   :  { %v115_v7 = vpop.f32.mrf.mxu0  ;;  %352 = vmatpush.msrb.mxu1 %v303_v6 }
  0xa7   :  { %v165_v12 = vrot.slane %v115_v7, 7  ;;  %v304_v7 = vld [vmem:[%s978_s2 + $0xe8] sm:$0xff] }
  0xa8   :  { %v138_v17 = vpop.f32.mrf.mxu1 }
  0xa9   :  { %v168_v13 = vsel %vm166_vm1, %v165_v12, %v164_v9  ;;  %v167_v18 = vsel %vm166_vm1, %v164_v9, %v165_v12  ;;  %v300_v9 = vld [vmem:[%s978_s2 + $0xc8] sm:$0xff] }
  0xaa   :  { %v169_v14 = vmul.f32 %v757_v11, %v168_v13  ;;  %v179_v25 = vadd.f32 %v167_v18, %v138_v17  ;;  %353 = vmatpush.msrb.mxu1 %v300_v9  ;;  %v296_v12 = vld [vmem:[%s978_s2 + $0xa8] sm:$0xff]  ;;  %v297_v13 = vld [vmem:[%s978_s2 + $0xb0] sm:$0xff]  ;;  %v295_v17 = vld [vmem:[%s978_s2 + $0xa0] sm:$0xff] }
  0xab   :  { %331 = vmatpush.msrb.mxu0 %v296_v12  ;;  %v290_v18 = vld [vmem:[%s978_s2 + $0x78] sm:$0xff] }
  0xac   :  { %v161_v15 = vpop.f32.mrf.mxu2  ;;  %v178_v21 = vadd.f32 %v169_v14, %v135_v4  ;;  %v307_v4 = vld [vmem:[%s978_s2 + $0x100] sm:$0xff]  ;;  %v298_v14 = vld [vmem:[%s978_s2 + $0xb8] sm:$0xff]  ;;  %354 = vmatpush.msrb.mxu1 %v297_v13 }
  0xad   :  { %v172_v20 = vrot.slane %v161_v15, 1  ;;  %374 = vmatpush.msrb.mxu2 %v307_v4  ;;  %v293_v15 = vld [vmem:[%s978_s2 + $0x90] sm:$0xff] }
  0xae   :  { %332 = vmatpush.msrb.mxu0 %v293_v15 }
  0xaf   :  { %v174_v23 = vsel %vm173_vm3, %v171_v16, %v172_v20  ;;  %v175_v24 = vsel %vm173_vm3, %v172_v20, %v171_v16  ;;  %375 = vmatpush.msrb.mxu2 %v304_v7  ;;  %v294_v16 = vld [vmem:[%s978_s2 + $0x98] sm:$0xff]  ;;  %v291_v20 = vld [vmem:[%s978_s2 + $0x80] sm:$0xff] }
  0xb0   :  { %v177_v26 = vmul.f32 %v765_v19, %v175_v24  ;;  %v180_v27 = vadd.f32 %v178_v21, %v174_v23  ;;  %355 = vmatpush.msrb.mxu1 %v294_v16  ;;  %v292_v21 = vld [vmem:[%s978_s2 + $0x88] sm:$0xff]  ;;  %333 = vmatpush.msrb.mxu0 %v290_v18  ;;  %v287_v23 = vld [vmem:[%s978_s2 + $0x60] sm:$0xff] }
  0xb1   :  { %376 = vmatpush.msrb.mxu2 %v301_v10  ;;  %v288_v24 = vld [vmem:[%s978_s2 + $0x68] sm:$0xff] }
  0xb2   :  { %v181_v28 = vadd.f32 %v179_v25, %v177_v26  ;;  %v775_v29 = vadd.f32 %v487_v22, %v180_v27  ;;  %356 = vmatpush.msrb.mxu1 %v291_v20  ;;  %v289_v25 = vld [vmem:[%s978_s2 + $0x70] sm:$0xff]  ;;  %334 = vmatpush.msrb.mxu0 %v287_v23  ;;  %v284_v27 = vld [vmem:[%s978_s2 + $0x48] sm:$0xff]  ;;  %v488_v20 = vld [vmem:[%s976_s4 + $0x3] ss:$0 sm:$0xff] }
  0xb3   :  { %377 = vmatpush.msrb.mxu2 %v298_v14 }
  0xb4   :  { %v777_v30 = vadd.f32 %v487_v22, %v181_v28  ;;  %v192_v31 = vmul.f32 %v775_v29, %v775_v29  ;;  %357 = vmatpush.msrb.mxu1 %v288_v24  ;;  %v285_v28 = vld [vmem:[%s978_s2 + $0x50] sm:$0xff]  ;;  %335 = vmatpush.msrb.mxu0 %v284_v27 }
  0xb5   :  { %378 = vmatpush.msrb.mxu2 %v295_v17 }
  0xb6   :  { %v185_v32 = vadd.f32 %v777_v30, %v775_v29  ;;  %v193_v33 = vmul.f32 %v777_v30, %v777_v30  ;;  %358 = vmatpush.msrb.mxu1 %v285_v28 }
  0xb7   :  { %379 = vmatpush.msrb.mxu2 %v292_v21 }
  0xb8   :  { %v186_v34 = vrot.slane %v185_v32, 4  ;;  %v194_v35 = vadd.f32 %v193_v33, %v192_v31  ;;  %v286_v31 = vld [vmem:[%s978_s2 + $0x58] sm:$0xff]  ;;  %v281_v33 = vld [vmem:[%s978_s2 + $0x30] sm:$0xff] }
  0xb9   :  { %380 = vmatpush.msrb.mxu2 %v289_v25  ;;  %336 = vmatpush.msrb.mxu0 %v281_v33 }
  0xba   :  { %v187_v36 = vadd.f32 %v186_v34, %v185_v32  ;;  %v195_v37 = vrot.slane %v194_v35, 4  ;;  %v282_v34 = vld [vmem:[%s978_s2 + $0x38] sm:$0xff] }
  0xbb   :  { %381 = vmatpush.msrb.mxu2 %v286_v31  ;;  %359 = vmatpush.msrb.mxu1 %v282_v34 }
  0xbc   :  { %v188_v38 = vrot.slane %v187_v36, 2  ;;  %v196_v39 = vadd.f32 %v195_v37, %v194_v35  ;;  %v283_v35 = vld [vmem:[%s978_s2 + $0x40] sm:$0xff] }
  0xbd   :  { %v279_v37 = vld [vmem:[%s978_s2 + $0x20] sm:$0xff]  ;;  %382 = vmatpush.msrb.mxu2 %v283_v35 }
  0xbe   :  { %v189_v40 = vadd.f32 %v188_v38, %v187_v36  ;;  %v197_v41 = vrot.slane %v196_v39, 2  ;;  %v278_v36 = vld [vmem:[%s978_s2 + $0x18] sm:$0xff]  ;;  %360 = vmatpush.msrb.mxu1 %v279_v37 }
  0xbf   :  { %337 = vmatpush.msrb.mxu0 %v278_v36 }
  0xc0   :  { %v190_v42 = vrot.slane %v189_v40, 1  ;;  %v198_v43 = vadd.f32 %v197_v41, %v196_v39  ;;  %v280_v39 = vld [vmem:[%s978_s2 + $0x28] sm:$0xff] }
  0xc1   :  { %v276_v41 = vld [vmem:[%s978_s2 + $0x8] sm:$0xff]  ;;  %383 = vmatpush.msrb.mxu2 %v280_v39 }
  0xc2   :  { %v199_v44 = vrot.slane %v198_v43, 1  ;;  %v191_v45 = vadd.f32 %v190_v42, %v189_v40  ;;  %v275_v40 = vld [vmem:[%s978_s2] sm:$0xff]  ;;  %361 = vmatpush.msrb.mxu1 %v276_v41 }
  0xc3   :  { %338 = vmatpush.msrb.mxu0 %v275_v40 }
  0xc4   :  { %v200_v46 = vadd.f32 %v199_v44, %v198_v43  ;;  %v277_v43 = vld [vmem:[%s978_s2 + $0x10] sm:$0xff] }
  0xc5   :  { %384 = vmatpush.msrb.mxu2 %v277_v43 }
  0xc6   :  { %v202_v48 = vsel %vm201_vm4, %v191_v45, %v200_v46 }
  0xc7   :  { %235 = vmatmul.f32.vlgmr.msra.gmra.mxu3 %v202_v48 }
 0x14a   :  { %v236_v22 = vpop.f32.mrf.mxu3 }
 0x14b   :  { %v239_v26 = vmul.f32 %v236_v22, %v236_v22 }
 0x14d   :  { %v241_v32 = vrot.slane %v239_v26, 7 }
 0x14f   :  { %v243_v38 = vsub.f32 %v236_v22, %v241_v32 }
 0x151   :  { %v244_v42 = vadd.f32 1e-05, %v243_v38 }
 0x153   :  { %489 = vrsqrt.f32 %v244_v42  ;;  %vm251_vm6 = vweird.f32 %v244_v42 }
 0x159   :  { %v490_v44 = vpop.eup %489 }
 0x15a   :  { %v246_v45 = vmul.f32 %v490_v44, %v244_v42  ;;  %vm252_vm5 = vweird.f32 %v490_v44 }
 0x15b   :  { %vm253_vm7 = vmor %vm251_vm6, %vm252_vm5 }
 0x15c   :  { %v247_v46 = vmul.f32 %v490_v44, %v246_v45 }
 0x15e   :  { %v248_v48 = vmul.f32 0.5, %v247_v46 }
 0x160   :  { %v249_v50 = vsub.f32 1.5, %v248_v48 }
 0x162   :  { %v250_v51 = vmul.f32 %v490_v44, %v249_v50 }
 0x164   :  { %v254_v53 = vsel %vm253_vm7, %v490_v44, %v250_v51 }
 0x165   :  { %v256_v54 = vrot.slane %v254_v53, 1 }
 0x167   :  { %v258_v55 = vmul.f32 %v256_v54, %v42_v52 }
 0x169   :  { %v259_v57 = vmul.f32 %v258_v55, %v236_v22  ;;  %v261_v58 = vperm.slane %v258_v55, 0 }
 0x16b   :  { %v260_v59 = vsub.f32 %v43_v56, %v259_v57  ;;  %v262_v61 = vmul.f32 %v261_v58, %v775_v29  ;;  %v263_v1 = vmul.f32 %v261_v58, %v777_v30 }
 0x16d   :  { %v264_v60 = vperm.slane %v260_v59, 0  ;;  %v45_v59 = vld [vmem:[%s976_s4 + $0x4] sm:$0x1] }
 0x16f   :  { %v265_v63 = vadd.f32 %v264_v60, %v262_v61  ;;  %v266_v4 = vadd.f32 %v264_v60, %v263_v1 }
 0x171   :  { %vm268_vm8 = vcmp.gt.f32.partialorder %v265_v63, 0.0  ;;  %v271_v0 = vmul.f32 %v270_v62, %v265_v63  ;;  %v272_v5 = vmul.f32 %v270_v62, %v266_v4  ;;  %vm269_vm9 = vcmp.gt.f32.partialorder %v266_v4, 0.0 }
 0x173   :  { %v273_v3 = vsel %vm268_vm8, %v265_v63, %v271_v0  ;;  %v274_v6 = vsel %vm269_vm9, %v266_v4, %v272_v5  ;;  %v46_v63 = vld [vmem:[%s976_s4 + $0x5] sm:$0x1] }
 0x174   :  { %339 = vmatmul.f32.vlgmr.msrb.gmra.mxu0 %v273_v3  ;;  %362 = vmatmul.f32.vlgmr.msrb.gmra.mxu1 %v273_v3 }
 0x175   :  { %385 = vmatmul.f32.vlgmr.msrb.gmra.mxu2 %v273_v3 }
 0x17c   :  { %342 = vmatmul.f32.gmra.mxu0 %v274_v6  ;;  %365 = vmatmul.f32.gmra.mxu1 %v274_v6 }
 0x17d   :  { %388 = vmatmul.f32.gmra.mxu2 %v274_v6 }
 0x1f1   :  { %v340_v29 = vpop.f32.mrf.mxu0  ;;  %v363_v8 = vpop.f32.mrf.mxu1 }
 0x1f2   :  { %v392_v10 = vrot.slane %v340_v29, 7 }
 0x1f8   :  { %v386_v7 = vpop.f32.mrf.mxu2 }
 0x1f9   :  { %v343_v9 = vpop.f32.mrf.mxu0  ;;  %v398_v15 = vrot.slane %v386_v7, 1  ;;  %v366_v21 = vpop.f32.mrf.mxu1 }
 0x1fa   :  { %v393_v12 = vrot.slane %v343_v9, 7 }
 0x1fc   :  { %v395_v30 = vsel %vm166_vm1, %v393_v12, %v392_v10  ;;  %v394_v16 = vsel %vm166_vm1, %v392_v10, %v393_v12 }
 0x1fd   :  { %v396_v13 = vmul.f32 %v757_v11, %v395_v30  ;;  %v405_v24 = vadd.f32 %v394_v16, %v366_v21 }
 0x1ff   :  { %v404_v18 = vadd.f32 %v396_v13, %v363_v8 }
 0x200   :  { %v389_v14 = vpop.f32.mrf.mxu2 }
 0x201   :  { %v399_v17 = vrot.slane %v389_v14, 1 }
 0x203   :  { %v400_v22 = vsel %vm173_vm3, %v398_v15, %v399_v17  ;;  %v401_v23 = vsel %vm173_vm3, %v399_v17, %v398_v15 }
 0x204   :  { %v403_v11 = vmul.f32 %v765_v19, %v401_v23  ;;  %v406_v25 = vadd.f32 %v404_v18, %v400_v22 }
 0x206   :  { %v407_v26 = vadd.f32 %v405_v24, %v403_v11  ;;  %v409_v27 = vadd.f32 %v488_v20, %v406_v25 }
 0x208   :  { %v410_v28 = vadd.f32 %v488_v20, %v407_v26  ;;  %v418_v32 = vmul.f32 %v409_v27, %v409_v27 }
 0x20a   :  { %v411_v31 = vadd.f32 %v410_v28, %v409_v27  ;;  %v419_v33 = vmul.f32 %v410_v28, %v410_v28 }
 0x20c   :  { %v412_v34 = vrot.slane %v411_v31, 4  ;;  %v420_v35 = vadd.f32 %v419_v33, %v418_v32 }
 0x20e   :  { %v413_v36 = vadd.f32 %v412_v34, %v411_v31  ;;  %v421_v37 = vrot.slane %v420_v35, 4 }
 0x210   :  { %v414_v38 = vrot.slane %v413_v36, 2  ;;  %v422_v39 = vadd.f32 %v421_v37, %v420_v35 }
 0x212   :  { %v415_v40 = vadd.f32 %v414_v38, %v413_v36  ;;  %v423_v41 = vrot.slane %v422_v39, 2 }
 0x214   :  { %v416_v2 = vrot.slane %v415_v40, 1  ;;  %v424_v42 = vadd.f32 %v423_v41, %v422_v39 }
 0x216   :  { %v425_v43 = vrot.slane %v424_v42, 1  ;;  %v417_v44 = vadd.f32 %v416_v2, %v415_v40 }
 0x218   :  { %v426_v19 = vadd.f32 %v425_v43, %v424_v42 }
 0x21a   :  { %v427_v45 = vsel %vm201_vm4, %v417_v44, %v426_v19 }
 0x21b   :  { %444 = vmatmul.f32.vlgmr.msrb.gmra.mxu3 %v427_v45 }
 0x29e   :  { %v445_v46 = vpop.f32.mrf.mxu3 }
 0x29f   :  { %v448_v48 = vmul.f32 %v445_v46, %v445_v46 }
 0x2a1   :  { %v450_v50 = vrot.slane %v448_v48, 7 }
 0x2a3   :  { %v452_v51 = vsub.f32 %v445_v46, %v450_v50 }
 0x2a5   :  { %v453_v52 = vadd.f32 1e-05, %v452_v51 }
 0x2a7   :  { %491 = vrsqrt.f32 %v453_v52  ;;  %vm460_vm11 = vweird.f32 %v453_v52 }
 0x2ad   :  { %v492_v53 = vpop.eup %491 }
 0x2ae   :  { %v455_v54 = vmul.f32 %v492_v53, %v453_v52  ;;  %vm461_vm10 = vweird.f32 %v492_v53 }
 0x2af   :  { %vm462_vm12 = vmor %vm460_vm11, %vm461_vm10 }
 0x2b0   :  { %v456_v55 = vmul.f32 %v492_v53, %v455_v54 }
 0x2b2   :  { %v457_v56 = vmul.f32 0.5, %v456_v55 }
 0x2b4   :  { %v458_v57 = vsub.f32 1.5, %v457_v56 }
 0x2b6   :  { %v459_v58 = vmul.f32 %v492_v53, %v458_v57 }
 0x2b8   :  { %v463_v60 = vsel %vm462_vm12, %v492_v53, %v459_v58 }
 0x2b9   :  { %v465_v61 = vrot.slane %v463_v60, 1 }
 0x2bb   :  { %v467_v62 = vmul.f32 %v465_v61, %v45_v59 }
 0x2bd   :  { %v468_v0 = vmul.f32 %v467_v62, %v445_v46  ;;  %v470_v1 = vperm.slane %v467_v62, 0 }
 0x2bf   :  { %v469_v3 = vsub.f32 %v46_v63, %v468_v0  ;;  %v471_v4 = vmul.f32 %v470_v1, %v409_v27  ;;  %v472_v5 = vmul.f32 %v470_v1, %v410_v28 }
 0x2c1   :  { %v473_v6 = vperm.slane %v469_v3, 0 }
 0x2c3   :  { %v474_v29 = vadd.f32 %v473_v6, %v471_v4  ;;  %v475_v7 = vadd.f32 %v473_v6, %v472_v5 }
 0x2c5   :  { %v476_v8 = vadd.f32 %v474_v29, %v673_v47  ;;  %v477_v9 = vadd.f32 %v475_v7, %v684_v49 }
 0x2c7   :  { %478 = vst [vmem:[%s980_s6] sm:$0xff] %v476_v8 }
 0x2c8   :  { %479 = vst [vmem:[%s980_s6 + $0x8] sm:$0xff] %v477_v9 }

</bundles_post_ra>
